<compile_context>
chip_gen: v7x
topology: tpu7x:2x2x1
jax: 0.10.0
libtpu: 0.0.40
codegen_flags: <defaults>
</compile_context>

<pallas_src>
import functools

import jax
import jax.numpy as jnp
from jax import lax
from jax.experimental import pallas as pl
from jax.experimental.pallas import tpu as pltpu


def _t2v_kernel(tau_ref, w_ref, b_ref, out_ref, *, act):
    # tau_ref: (1, TN)  lane-dense row of time values
    # w_ref  : (K, 1)   pre-concatenated [w || w0] column
    # b_ref  : (K, 1)   pre-concatenated [b || b0] column
    # out_ref: (K, TN)  rows 0..K-2 = periodic features, row K-1 = linear term
    tau = tau_ref[...]                              # (1, TN)
    z = tau * w_ref[...] + b_ref[...]               # (K, TN) VPU broadcast FMA
    k = out_ref.shape[0]
    row = lax.broadcasted_iota(jnp.int32, z.shape, 0)
    out_ref[...] = jnp.where(row < k - 1, act(z), z)


def _round_up(x, m):
    return ((x + m - 1) // m) * m


def time2vec(tau, w, b, w0, b0, *, activation="cos", tile_n=8192):
    """Time2Vec forward.

    tau: float32 array of arbitrary shape.
    w, b: (1, out_features - 1); w0, b0: (1, 1)   (in_features == 1).
    Returns (*tau.shape, out_features) matching torch.cat([f(tau@w+b), tau@w0+b0], -1).
    """
    act = {"cos": jnp.cos, "sin": jnp.sin}[activation]
    orig_shape = tau.shape
    n = tau.size
    k = w.shape[1] + 1                              # out_features

    # Lane-dense layout: N on the lane axis, padded to a multiple of the tile.
    tile_n = max(128, min(_round_up(tile_n, 128), _round_up(n, 128)))
    n_pad = _round_up(n, tile_n)
    tau_row = tau.reshape(1, n)
    if n_pad != n:
        tau_row = jnp.pad(tau_row, ((0, 0), (0, n_pad - n)))

    # Pre-concatenate params into (K, 1) columns: [w || w0], [b || b0].
    w_cat = jnp.concatenate([w, w0], axis=1).T      # (K, 1)
    b_cat = jnp.concatenate([b, b0], axis=1).T      # (K, 1)

    grid = (n_pad // tile_n,)
    out_t = pl.pallas_call(
        functools.partial(_t2v_kernel, act=act),
        out_shape=jax.ShapeDtypeStruct((k, n_pad), tau.dtype),
        grid_spec=pl.GridSpec(
            grid=grid,
            in_specs=[
                pl.BlockSpec((1, tile_n), lambda i: (0, i)),   # tau (lane-dense)
                pl.BlockSpec((k, 1), lambda i: (0, 0)),        # w_cat (resident)
                pl.BlockSpec((k, 1), lambda i: (0, 0)),        # b_cat (resident)
            ],
            out_specs=pl.BlockSpec((k, tile_n), lambda i: (0, i)),
        ),
        compiler_params=pltpu.CompilerParams(
            dimension_semantics=("parallel",)),
    )(tau_row, w_cat, b_cat)

    # Back to PyTorch output order/shape: (..., K). Pure layout plumbing.
    return out_t[:, :n].T.reshape(*orig_shape, k)


if __name__ == "__main__":
    # Module shapes: in_features must be 1 for the PyTorch forward to be
    # shape-consistent; out_features = 32, tau of shape (batch=2, seq=8).
    in_features, out_features = 1, 32
    B, S = 2, 8

    key = jax.random.PRNGKey(0)
    k1, k2, k3, k4, k5 = jax.random.split(key, 5)
    # Deterministic stand-ins for torch.randn parameter init.
    w0 = jax.random.normal(k1, (in_features, 1), dtype=jnp.float32)
    b0 = jax.random.normal(k2, (in_features, 1), dtype=jnp.float32)
    w = jax.random.normal(k3, (in_features, out_features - 1), dtype=jnp.float32)
    b = jax.random.normal(k4, (in_features, out_features - 1), dtype=jnp.float32)
    tau = jax.random.normal(k5, (B, S), dtype=jnp.float32)

    # Pure-JAX reference of the exact PyTorch forward, for both activations.
    tau_u = tau[..., None]                          # (B, S, 1)
    for act_name, act_fn in (("cos", jnp.cos), ("sin", jnp.sin)):
        out = jax.block_until_ready(
            time2vec(tau, w, b, w0, b0, activation=act_name))
        ref = jnp.concatenate(
            [act_fn(tau_u @ w + b), tau_u @ w0 + b0], axis=-1)
        assert out.shape == (B, S, out_features), out.shape
        assert jnp.allclose(out, ref, atol=1e-5, rtol=1e-5), act_name

    print("KERNEL_OK")
</pallas_src>

<mosaic_0001>
module attributes {stable_mosaic.version = 11 : i64} {
  func.func @_t2v_kernel(%arg0: i32, %arg1: memref<1x128xf32, #tpu.memory_space<vmem>>, %arg2: memref<32x1xf32, #tpu.memory_space<vmem>>, %arg3: memref<32x1xf32, #tpu.memory_space<vmem>>, %arg4: memref<32x128xf32, #tpu.memory_space<vmem>>) attributes {dimension_semantics = [#tpu.dimension_semantics<parallel>], iteration_bounds = array<i64: 1>, scalar_prefetch = 0 : i64, scratch_operands = 0 : i64, tpu.core_type = #tpu.core_type<tc>, window_params = [{transform_indices = @transform_0, window_bounds = array<i64: 1, 128>}, {pipeline_mode = #tpu.pipeline_mode<synchronous>, transform_indices = @transform_1, window_bounds = array<i64: 32, 1>}, {pipeline_mode = #tpu.pipeline_mode<synchronous>, transform_indices = @transform_2, window_bounds = array<i64: 32, 1>}, {transform_indices = @transform_3, window_bounds = array<i64: 32, 128>}]} {
    %c0 = arith.constant 0 : index
    %c0_0 = arith.constant 0 : index
    %0 = vector.load %arg1[%c0, %c0_0] : memref<1x128xf32, #tpu.memory_space<vmem>>, vector<1x128xf32>
    %c0_1 = arith.constant 0 : index
    %c0_2 = arith.constant 0 : index
    %1 = vector.load %arg2[%c0_1, %c0_2] : memref<32x1xf32, #tpu.memory_space<vmem>>, vector<32x1xf32>
    %2 = vector.broadcast %0 : vector<1x128xf32> to vector<32x128xf32>
    %3 = vector.broadcast %1 : vector<32x1xf32> to vector<32x128xf32>
    %4 = arith.mulf %2, %3 : vector<32x128xf32>
    %c0_3 = arith.constant 0 : index
    %c0_4 = arith.constant 0 : index
    %5 = vector.load %arg3[%c0_3, %c0_4] : memref<32x1xf32, #tpu.memory_space<vmem>>, vector<32x1xf32>
    %6 = vector.broadcast %5 : vector<32x1xf32> to vector<32x128xf32>
    %7 = arith.addf %4, %6 : vector<32x128xf32>
    %8 = tpu.iota {dimensions = array<i32: 0>} : vector<32x128xi32>
    %c31_i32 = arith.constant 31 : i32
    %9 = vector.broadcast %c31_i32 : i32 to vector<32x128xi32>
    %10 = arith.cmpi slt, %8, %9 : vector<32x128xi32>
    %11 = math.cos %7 : vector<32x128xf32>
    %12 = arith.select %10, %11, %7 : vector<32x128xi1>, vector<32x128xf32>
    %c0_5 = arith.constant 0 : index
    %c0_6 = arith.constant 0 : index
    %13 = vector.load %arg4[%c0_5, %c0_6] : memref<32x128xf32, #tpu.memory_space<vmem>>, vector<32x128xf32>
    tpu.vector_store %arg4[%c0_5, %c0_6], %12 {strides = array<i32>} : memref<32x128xf32, #tpu.memory_space<vmem>>, vector<32x128xf32>,
    return
  }
  func.func @transform_0(%arg0: i32) -> (i32, i32) {
    %c0_i32 = arith.constant 0 : i32
    %c0_i32_0 = arith.constant 0 : i32
    return %c0_i32, %arg0 : i32, i32
  }
  func.func @transform_1(%arg0: i32) -> (i32, i32) {
    %c0_i32 = arith.constant 0 : i32
    %c0_i32_0 = arith.constant 0 : i32
    %c0_i32_1 = arith.constant 0 : i32
    return %c0_i32, %c0_i32_0 : i32, i32
  }
  func.func @transform_2(%arg0: i32) -> (i32, i32) {
    %c0_i32 = arith.constant 0 : i32
    %c0_i32_0 = arith.constant 0 : i32
    %c0_i32_1 = arith.constant 0 : i32
    return %c0_i32, %c0_i32_0 : i32, i32
  }
  func.func @transform_3(%arg0: i32) -> (i32, i32) {
    %c0_i32 = arith.constant 0 : i32
    %c0_i32_0 = arith.constant 0 : i32
    return %c0_i32, %arg0 : i32, i32
  }
}

</mosaic_0001>

<bundles_post_ra>
// kernel: tpu_custom_call.1
= control target key start
LH: loop header
LB: loop body
LE: loop exit
PB: predicated region body
PF: predicated region fallthrough
CT: control target
= control target key end

     0   :  { %v608_v2 = vmov 0   ;;  %s972_s0 = inlined_call_operand.vmem [shape: f32[1,128], index: 0, kind: input, shape index: {}]   ;;  %s973_s1 = inlined_call_operand.vmem [shape: f32[32,1], index: 1, kind: input, shape index: {}]   ;;  %s974_s2 = inlined_call_operand.vmem [shape: f32[32,1], index: 2, kind: input, shape index: {}]   ;;  %s975_s3 = inlined_call_operand.hbm [shape: f32[32,128], index: 3, kind: output, shape index: {}]  }
   0x1   :  { %v19_v0 = vld [vmem:[%s973_s1 + $0x18] sm:$0xff]  ;;  %v17_v1 = vld [vmem:[%s973_s1 + $0x8] sm:$0xff]  ;;  %567 = vset.pattern.permute.xlu1 %v608_v2  ;;  %566 = vset.pattern.permute.xlu0 %v608_v2  ;;  %v18_v3 = vld [vmem:[%s973_s1 + $0x10] sm:$0xff] }
   0x2   :  { %43 = vperm.xlu0 %566, %v19_v0   ;;  %33 = vperm.xlu1 %567, %v17_v1   ;;  %v16_v4 = vld [vmem:[%s973_s1] sm:$0xff] }
   0x3   :  { %8 = vsyncpa [#allocation3], 0  ;;  %v50_v5 = vld [vmem:[%s974_s2] sm:$0xff]  ;;  %v53_v6 = vld [vmem:[%s974_s2 + $0x18] sm:$0xff]  ;;  %v609_v52 = vmov 683565275  }
   0x4   :  { %v52_v7 = vld [vmem:[%s974_s2 + $0x10] sm:$0xff]  ;;  %v51_v8 = vld [vmem:[%s974_s2 + $0x8] sm:$0xff]  ;;  %v523_v11 = vld [vmem:[%s972_s0] ss:$0 sm:$0xff]  ;;  %v610_v56 = vmov 2475754826  }
   0x5   :  { %v611_v58 = vmov 2131351028   ;;  %v612_v60 = vmov 2102212464   ;;  %v613_v62 = vmov 920167782  }
   0x6   :  { %38 = vperm.xlu1 %567, %v18_v3   ;;  %28 = vperm.xlu0 %566, %v16_v4   ;;  %s615_s0 = smov [#allocation2]  }
   0x7   :  { %s512_s2 = sshll.u32 %s615_s0, 4  ;;  %s513_s2 = int_to_ptr.vmem [resolvable:$true] %s512_s2 }
   0x8   :  { %s584_s29 = scalar_lea.vmem %s513_s2, 512  ;;  %p589_p1 = scmp.lt.s32.totalorder %s513_s2, %s513_s2 }
   0x9   :  { %p585_p0 = scmp.ne.s32.totalorder %s513_s2, %s584_s29  ;;  %p590_p2 = scmp.lt.s32.totalorder %s584_s29, %s584_s29 }
   0xa   :  { %56 = vperm.xlu1 %567, %v50_v5   ;;  %71 = vperm.xlu0 %566, %v53_v6   ;;  %v614_v5 = vmov 1326507024  }
   0xb   :  { %p591_p3 = por %p590_p2, %p589_p1 }
   0xd   :  { %p592_p4 = pnand %p591_p3, %p585_p0 }
   0xe   :  { %66 = vperm.xlu1 %567, %v52_v7   ;;  %61 = vperm.xlu0 %566, %v51_v8  }
  0x81   :  { %v44_v9 = vpop.permute.xlu0 %43  ;;  %v34_v10 = vpop.permute.xlu1 %33 }
  0x82   :  { %v49_v14 = vmul.f32 %v523_v11, %v44_v9  ;;  %v47_v40 = vmul.f32 %v523_v11, %v34_v10 }
  0x85   :  { %v39_v12 = vpop.permute.xlu1 %38  ;;  %v29_v13 = vpop.permute.xlu0 %28 }
  0x86   :  { %v46_v15 = vmul.f32 %v523_v11, %v29_v13  ;;  %v48_v20 = vmul.f32 %v523_v11, %v39_v12 }
  0x89   :  { %v57_v16 = vpop.permute.xlu1 %56  ;;  %v72_v17 = vpop.permute.xlu0 %71 }
  0x8a   :  { %v665_v18 = vadd.f32 %v57_v16, %v46_v15  ;;  %v667_v19 = vadd.f32 %v72_v17, %v49_v14 }
  0x8c   :  { %v87_v21 = vand.u32 2147483647, %v665_v18  ;;  %v90_v22 = vand.u32 2139095040, %v665_v18  ;;  %v396_v23 = vand.u32 2147483647, %v667_v19  ;;  %v399_v24 = vand.u32 2139095040, %v667_v19 }
  0x8d   :  { %v67_v25 = vpop.permute.xlu1 %66  ;;  %v62_v39 = vpop.permute.xlu0 %61 }
  0x8e   :  { %v91_v26 = vshrl.u32 %v90_v22, 23  ;;  %v673_v27 = vadd.f32 %v67_v25, %v48_v20  ;;  %v94_v28 = vand.u32 8388607, %v87_v21  ;;  %v400_v29 = vshrl.u32 %v399_v24, 23 }
  0x8f   :  { %v403_v30 = vand.u32 8388607, %v396_v23  ;;  %v680_v46 = vadd.f32 %v62_v39, %v47_v40 }
  0x90   :  { %v524_v31 = vadd.s32 4294967169, %v91_v26  ;;  %v536_v32 = vadd.s32 4294967169, %v400_v29  ;;  %v296_v33 = vand.u32 2139095040, %v673_v27  ;;  %v95_v35 = vor.u32 8388608, %v94_v28 }
  0x91   :  { %v404_v36 = vor.u32 8388608, %v403_v30  ;;  %v293_v50 = vand.u32 2147483647, %v673_v27 }
  0x92   :  { %v97_v34 = vadd.s32 1, %v524_v31  ;;  %v406_v37 = vadd.s32 1, %v536_v32  ;;  %v297_v38 = vshrl.u32 %v296_v33, 23  ;;  %v682_v47 = vshll.u32 %v95_v35, 8 }
  0x93   :  { %v686_v49 = vshll.u32 %v404_v36, 8 }
  0x94   :  { %vm98_vm0 = vcmp.gt.s32.totalorder %v97_v34, 0  ;;  %vm407_vm1 = vcmp.gt.s32.totalorder %v406_v37, 0  ;;  %v532_v42 = vadd.s32 4294967169, %v297_v38 }
  0x95   :  { %v99_v41 = vsel %vm98_vm0, %v97_v34, 0  ;;  %v408_v45 = vsel %vm407_vm1, %v406_v37, 0 }
  0x96   :  { %v100_v43 = vshrl.u32 %v99_v41, 5  ;;  %v101_v44 = vand.u32 31, %v99_v41  ;;  %v684_v48 = vshrl.u32 %v408_v45, 5  ;;  %v410_v54 = vand.u32 31, %v408_v45 }
  0x97   :  { %v690_v55 = vadd.s32 1, %v532_v42 }
  0x98   :  { %v102_v51 = vsub.s32 32, %v101_v44  ;;  %v104_v53 = vshll.u32 %v609_v52, %v101_v44  ;;  %v107_v57 = vshll.u32 %v610_v56, %v101_v44  ;;  %v110_v59 = vshll.u32 %v611_v58, %v101_v44 }
  0x99   :  { %v113_v61 = vshll.u32 %v612_v60, %v101_v44  ;;  %v116_v63 = vshll.u32 %v613_v62, %v101_v44  ;;  %vm119_vm2 = vcmp.lt.s32.totalorder %v100_v43, 1  ;;  %vm120_vm3 = vcmp.lt.s32.totalorder %v100_v43, 2 }
  0x9a   :  { %v105_v0 = vshrl.u32 %v610_v56, %v102_v51  ;;  %v108_v1 = vshrl.u32 %v611_v58, %v102_v51  ;;  %v111_v2 = vshrl.u32 %v612_v60, %v102_v51  ;;  %v103_v3 = vshrl.u32 %v609_v52, %v102_v51 }
  0x9b   :  { %v114_v4 = vshrl.u32 %v613_v62, %v102_v51  ;;  %v117_v6 = vshrl.u32 %v614_v5, %v102_v51  ;;  %v411_v10 = vsub.s32 32, %v410_v54  ;;  %vm121_vm4 = vcmp.lt.s32.totalorder %v100_v43, 3 }
  0x9c   :  { %v106_v7 = vor.u32 %v105_v0, %v104_v53  ;;  %v109_v8 = vor.u32 %v108_v1, %v107_v57  ;;  %v112_v9 = vor.u32 %v111_v2, %v110_v59  ;;  %vm122_vm5 = vcmp.lt.s32.totalorder %v100_v43, 4 }
  0x9d   :  { %v115_v11 = vor.u32 %v114_v4, %v113_v61  ;;  %v118_v12 = vor.u32 %v117_v6, %v116_v63  ;;  %v413_v24 = vshll.u32 %v609_v52, %v410_v54  ;;  %v414_v28 = vshrl.u32 %v610_v56, %v411_v10 }
  0x9e   :  { %v123_v13 = vsel %vm119_vm2, %v103_v3, %v106_v7  ;;  %v124_v14 = vsel %vm122_vm5, %v112_v9, 2102212464  ;;  %v127_v15 = vsel %vm119_vm2, %v106_v7, %v109_v8  ;;  %v131_v16 = vsel %vm119_vm2, %v109_v8, %v112_v9 }
  0x9f   :  { %v125_v17 = vsel %vm121_vm4, %v109_v8, %v124_v14  ;;  %v128_v20 = vsel %vm122_vm5, %v115_v11, 920167782  ;;  %v132_v22 = vsel %vm122_vm5, %v118_v12, 1326507024  ;;  %v416_v29 = vshll.u32 %v610_v56, %v410_v54 }
  0xa0   :  { %v129_v25 = vsel %vm121_vm4, %v112_v9, %v128_v20  ;;  %v133_v26 = vsel %vm121_vm4, %v115_v11, %v132_v22  ;;  %v126_v30 = vsel %vm120_vm3, %v123_v13, %v125_v17  ;;  %v417_v33 = vshrl.u32 %v611_v58, %v411_v10 }
  0xa1   :  { %v130_v31 = vsel %vm120_vm3, %v127_v15, %v129_v25  ;;  %v134_v32 = vsel %vm120_vm3, %v131_v16, %v133_v26  ;;  %v415_v38 = vor.u32 %v414_v28, %v413_v24  ;;  %v419_v40 = vshll.u32 %v611_v58, %v410_v54 }
  0xa2   :  { %v713_v34 = vmul.u32.u64.low %v682_v47, %v134_v32  ;;  %v714_v35 = vmul.u32.u64.high %v682_v47, %v134_v32, %v713_v34  ;;  %v717_v36 = vmul.u32.u64.low %v682_v47, %v130_v31  ;;  %v718_v37 = vmul.u32.u64.high %v682_v47, %v130_v31, %v717_v36 }
  0xa3   :  { %v418_v39 = vor.u32 %v417_v33, %v416_v29  ;;  %v420_v41 = vshrl.u32 %v612_v60, %v411_v10  ;;  %v412_v42 = vshrl.u32 %v609_v52, %v411_v10  ;;  %v422_v43 = vshll.u32 %v612_v60, %v410_v54 }
  0xa4   :  { %v423_v44 = vshrl.u32 %v613_v62, %v411_v10  ;;  %v426_v45 = vshrl.u32 %v614_v5, %v411_v10  ;;  %v142_v51 = vmul.u32 %v682_v47, %v126_v30  ;;  %v425_v57 = vshll.u32 %v613_v62, %v410_v54 }
  0xa5   :  { %v421_v53 = vor.u32 %v420_v41, %v419_v40  ;;  %vm428_vm6 = vcmp.lt.s32.totalorder %v684_v48, 1  ;;  %vm144_vm7 = vc.u32 %v714_v35, %v717_v36  ;;  %v145_v59 = vadd.s32 1, %v718_v37 }
  0xa6   :  { %v424_v61 = vor.u32 %v423_v44, %v422_v43  ;;  %vm429_vm8 = vcmp.lt.s32.totalorder %v684_v48, 2  ;;  %v427_v63 = vor.u32 %v426_v45, %v425_v57  ;;  %vm430_vm9 = vcmp.lt.s32.totalorder %v684_v48, 3 }
  0xa7   :  { %vm431_vm10 = vcmp.lt.s32.totalorder %v684_v48, 4  ;;  %v436_v0 = vsel %vm428_vm6, %v415_v38, %v418_v39  ;;  %v146_v47 = vsel %vm144_vm7, %v145_v59, %v718_v37  ;;  %v440_v2 = vsel %vm428_vm6, %v418_v39, %v421_v53 }
  0xa8   :  { %v433_v1 = vsel %vm431_vm10, %v421_v53, 2102212464  ;;  %v437_v54 = vsel %vm431_vm10, %v424_v61, 920167782  ;;  %v147_v3 = vadd.s32 %v146_v47, %v142_v51  ;;  %v432_v4 = vsel %vm428_vm6, %v412_v42, %v415_v38 }
  0xa9   :  { %v438_v6 = vsel %vm430_vm9, %v421_v53, %v437_v54  ;;  %v441_v7 = vsel %vm431_vm10, %v427_v63, 1326507024  ;;  %v434_v8 = vsel %vm430_vm9, %v418_v39, %v433_v1  ;;  %vm304_vm11 = vcmp.gt.s32.totalorder %v690_v55, 0 }
  0xaa   :  { %v439_v9 = vsel %vm429_vm8, %v436_v0, %v438_v6  ;;  %v442_v10 = vsel %vm430_vm9, %v424_v61, %v441_v7  ;;  %v148_v11 = vadd.s32 536870912, %v147_v3  ;;  %v300_v17 = vand.u32 8388607, %v293_v50 }
  0xab   :  { %v443_v12 = vsel %vm429_vm8, %v440_v2, %v442_v10  ;;  %v743_v13 = vmul.u32.u64.low %v686_v49, %v439_v9  ;;  %v744_v14 = vmul.u32.u64.high %v686_v49, %v439_v9, %v743_v13  ;;  %v305_v20 = vsel %vm304_vm11, %v690_v55, 0 }
  0xac   :  { %v748_v15 = vmul.u32.u64.low %v686_v49, %v443_v12  ;;  %v749_v16 = vmul.u32.u64.high %v686_v49, %v443_v12, %v748_v15  ;;  %v754_v22 = vshrl.u32 %v148_v11, 30  ;;  %v435_v24 = vsel %vm429_vm8, %v432_v4, %v434_v8 }
  0xad   :  { %v307_v25 = vand.u32 31, %v305_v20  ;;  %v454_v28 = vadd.s32 1, %v744_v14  ;;  %v451_v30 = vmul.u32 %v686_v49, %v435_v24  ;;  %v301_v31 = vor.u32 8388608, %v300_v17 }
  0xae   :  { %v150_v26 = vshll.u32 %v754_v22, 30  ;;  %vm453_vm12 = vc.u32 %v749_v16, %v743_v13  ;;  %v193_v32 = vand.u32 2139095040, %v680_v46  ;;  %v306_v45 = vshrl.u32 %v305_v20, 5 }
  0xaf   :  { %v308_v29 = vsub.s32 32, %v307_v25  ;;  %v455_v33 = vsel %vm453_vm12, %v454_v28, %v744_v14  ;;  %v310_v38 = vshll.u32 %v609_v52, %v307_v25  ;;  %v316_v41 = vshll.u32 %v611_v58, %v307_v25 }
  0xb0   :  { %v151_v55 = vsub.s32 %v147_v3, %v150_v26  ;;  %v456_v34 = vadd.s32 %v455_v33, %v451_v30  ;;  %v770_v42 = vshll.u32 %v301_v31, 8  ;;  %v194_v43 = vshrl.u32 %v193_v32, 23 }
  0xb1   :  { %v311_v48 = vshrl.u32 %v610_v56, %v308_v29  ;;  %v314_v39 = vshrl.u32 %v611_v58, %v308_v29  ;;  %v317_v40 = vshrl.u32 %v612_v60, %v308_v29  ;;  %v313_v53 = vshll.u32 %v610_v56, %v307_v25 }
  0xb2   :  { %v153_v37 = vsub.s32 0, %v151_v55  ;;  %v457_v49 = vadd.s32 536870912, %v456_v34  ;;  %v319_v61 = vshll.u32 %v612_v60, %v307_v25  ;;  %v320_v63 = vshrl.u32 %v613_v62, %v308_v29 }
  0xb3   :  { %v312_v51 = vor.u32 %v311_v48, %v310_v38  ;;  %v318_v59 = vor.u32 %v317_v40, %v316_v41  ;;  %v143_v0 = vadd.s32 %v717_v36, %v714_v35  ;;  %v315_v1 = vor.u32 %v314_v39, %v313_v53 }
  0xb4   :  { %v525_v44 = vmin.u32 %v153_v37, %v151_v55  ;;  %v773_v57 = vshrl.u32 %v457_v49, 30  ;;  %v323_v54 = vshrl.u32 %v614_v5, %v308_v29  ;;  %v309_v3 = vshrl.u32 %v609_v52, %v308_v29 }
  0xb5   :  { %v321_v4 = vor.u32 %v320_v63, %v319_v61  ;;  %v322_v6 = vshll.u32 %v613_v62, %v307_v25  ;;  %vm325_vm13 = vcmp.lt.s32.totalorder %v306_v45, 1  ;;  %vm327_vm14 = vcmp.lt.s32.totalorder %v306_v45, 3 }
  0xb6   :  { %v155_v47 = vclz %v525_v44  ;;  %v459_v2 = vshll.u32 %v773_v57, 30  ;;  %vm328_vm15 = vcmp.lt.s32.totalorder %v306_v45, 4  ;;  %v329_v35 = vsel %vm325_vm13, %v309_v3, %v312_v51 }
  0xb7   :  { %v324_v9 = vor.u32 %v323_v54, %v322_v6  ;;  %v330_v36 = vsel %vm328_vm15, %v318_v59, 2102212464  ;;  %v333_v11 = vsel %vm325_vm13, %v312_v51, %v315_v1  ;;  %v334_v12 = vsel %vm328_vm15, %v321_v4, 920167782 }
  0xb8   :  { %v526_v7 = vadd.s32 4294967294, %v155_v47  ;;  %v783_v8 = vsub.s32 %v456_v34, %v459_v2  ;;  %v331_v10 = vsel %vm327_vm14, %v315_v1, %v330_v36  ;;  %vm326_vm1 = vcmp.lt.s32.totalorder %v306_v45, 2 }
  0xb9   :  { %v528_v17 = vadd.s32 4294967169, %v194_v43  ;;  %vm89_vm2 = vcmp.lt.s32.totalorder %v665_v18, 0  ;;  %v332_v25 = vsel %vm326_vm1, %v329_v35, %v331_v10  ;;  %v335_v26 = vsel %vm327_vm14, %v318_v59, %v334_v12 }
  0xba   :  { %vm527_vm0 = vcmp.lt.s32.totalorder %v526_v7, 0  ;;  %v462_v15 = vsub.s32 0, %v783_v8  ;;  %vm398_vm3 = vcmp.lt.s32.totalorder %v667_v19, 0  ;;  %v336_v29 = vsel %vm326_vm1, %v333_v11, %v335_v26 }
  0xbb   :  { %v158_v14 = vsel %vm527_vm0, 0, %v526_v7  ;;  %v337_v30 = vsel %vm325_vm13, %v315_v1, %v318_v59  ;;  %v338_v31 = vsel %vm328_vm15, %v324_v9, 1326507024  ;;  %vm812_vm4 = vcmp.le.f32.partialorder %v87_v21, 0.7853982 }
  0xbc   :  { %v159_v20 = vsub.s32 32, %v158_v14  ;;  %v163_v24 = vsub.s32 4294967266, %v158_v14  ;;  %v537_v28 = vmin.u32 %v462_v15, %v783_v8  ;;  %v160_v32 = vshll.u32 %v151_v55, %v158_v14 }
  0xbd   :  { %v339_v48 = vsel %vm327_vm14, %v321_v4, %v338_v31  ;;  %v802_v39 = vmul.u32.u64.low %v770_v42, %v336_v29  ;;  %v803_v40 = vmul.u32.u64.high %v770_v42, %v336_v29, %v802_v39  ;;  %v173_v45 = vsub.s32 4, %v754_v22 }
  0xbe   :  { %v161_v33 = vshrl.u32 %v143_v0, %v159_v20  ;;  %v164_v34 = vadd.s32 127, %v163_v24  ;;  %v464_v37 = vclz %v537_v28  ;;  %v340_v38 = vsel %vm326_vm1, %v337_v30, %v339_v48 }
  0xbf   :  { %v807_v43 = vmul.u32.u64.low %v770_v42, %v340_v38  ;;  %v808_v44 = vmul.u32.u64.high %v770_v42, %v340_v38, %v807_v43  ;;  %v200_v53 = vadd.s32 1, %v528_v17  ;;  %v452_v61 = vadd.s32 %v743_v13, %v749_v16 }
  0xc0   :  { %v162_v49 = vor.u32 %v161_v33, %v160_v32  ;;  %v165_v41 = vshll.u32 %v164_v34, 23  ;;  %v538_v51 = vadd.s32 4294967294, %v464_v37  ;;  %v482_v63 = vsub.s32 4, %v773_v57 }
  0xc1   :  { %v190_v0 = vand.u32 2147483647, %v680_v46  ;;  %v348_v47 = vmul.u32 %v770_v42, %v332_v25  ;;  %v351_v21 = vadd.s32 1, %v803_v40  ;;  %vm201_vm6 = vcmp.gt.s32.totalorder %v200_v53, 0 }
  0xc2   :  { %v166_v59 = vor.u32 4788187, %v165_v41  ;;  %vm539_vm5 = vcmp.lt.s32.totalorder %v538_v51, 0  ;;  %v169_v54 = vcvt.s32.f32 %v162_v49  ;;  %vm350_vm7 = vc.u32 %v808_v44, %v802_v39 }
  0xc3   :  { %v467_v2 = vsel %vm539_vm5, 0, %v538_v51  ;;  %v174_v13 = vsel %vm89_vm2, %v173_v45, %v754_v22  ;;  %v352_v4 = vsel %vm350_vm7, %v351_v21, %v803_v40  ;;  %v483_v42 = vsel %vm398_vm3, %v482_v63, %v773_v57 }
  0xc4   :  { %v167_v1 = vand.u32 2147483647, %v166_v59  ;;  %v468_v16 = vsub.s32 32, %v467_v2  ;;  %v472_v3 = vsub.s32 4294967266, %v467_v2  ;;  %v353_v7 = vadd.s32 %v352_v4, %v348_v47 }
  0xc5   :  { %v202_v9 = vsel %vm201_vm6, %v200_v53, 0  ;;  %v469_v35 = vshll.u32 %v783_v8, %v467_v2  ;;  %v176_v22 = vsel %vm812_vm4, 0, %v174_v13  ;;  %vm837_vm8 = vcmp.le.f32.partialorder %v396_v23, 0.7853982 }
  0xc6   :  { %v170_v6 = vmul.f32 %v169_v54, %v167_v1  ;;  %v470_v36 = vshrl.u32 %v452_v61, %v468_v16  ;;  %v473_v10 = vadd.s32 127, %v472_v3  ;;  %v204_v11 = vand.u32 31, %v202_v9 }
  0xc7   :  { %v354_v15 = vadd.s32 536870912, %v353_v7  ;;  %v485_v20 = vsel %vm837_vm8, 0, %v483_v42  ;;  %v197_v26 = vand.u32 8388607, %v190_v0  ;;  %v852_v28 = vand.u32 3, %v176_v22 }
  0xc8   :  { %v171_v12 = vxor.u32 2147483648, %v170_v6  ;;  %v471_v17 = vor.u32 %v470_v36, %v469_v35  ;;  %v474_v57 = vshll.u32 %v473_v10, 23  ;;  %v205_v8 = vsub.s32 32, %v204_v11 }
  0xc9   :  { %v845_v25 = vshrl.u32 %v354_v15, 30  ;;  %v78_v30 = vlaneseq  ;;  %v854_v31 = vand.u32 3, %v485_v20  ;;  %v198_v40 = vor.u32 8388608, %v197_v26 }
  0xca   :  { %v172_v24 = vsel %vm89_vm2, %v171_v12, %v170_v6  ;;  %v475_v29 = vor.u32 4788187, %v474_v57  ;;  %v208_v33 = vshrl.u32 %v610_v56, %v205_v8  ;;  %v478_v48 = vcvt.s32.f32 %v471_v17 }
  0xcb   :  { %v175_v23 = vsel %vm812_vm4, %v665_v18, %v172_v24  ;;  %v356_v32 = vshll.u32 %v845_v25, 30  ;;  %v211_v37 = vshrl.u32 %v611_v58, %v205_v8  ;;  %v207_v49 = vshll.u32 %v609_v52, %v204_v11 }
  0xcc   :  { %568 = vcosq.f32 %v175_v23  ;;  %v476_v34 = vand.u32 2147483647, %v475_v29  ;;  %v214_v41 = vshrl.u32 %v612_v60, %v205_v8  ;;  %v863_v55 = vshrl.u32 %v202_v9, 5 }
  0xcd   :  { %570 = vsinq.f32 %v175_v23  ;;  %v859_v38 = vsub.s32 %v353_v7, %v356_v32  ;;  %v210_v45 = vshll.u32 %v610_v56, %v204_v11  ;;  %v866_v51 = vshrl.u32 %v78_v30, 7 }
  0xce   :  { %v479_v43 = vmul.f32 %v478_v48, %v476_v34  ;;  %vm185_vm9 = vcmp.eq.s32.totalorder %v852_v28, 2  ;;  %v209_v59 = vor.u32 %v208_v33, %v207_v49  ;;  %v213_v61 = vshll.u32 %v611_v58, %v204_v11 }
  0xcf   :  { %v359_v53 = vsub.s32 0, %v859_v38  ;;  %v217_v63 = vshrl.u32 %v613_v62, %v205_v8  ;;  %vm182_vm10 = vcmp.eq.s32.totalorder %v852_v28, 0  ;;  %v212_v21 = vor.u32 %v211_v37, %v210_v45 }
  0xd0   :  { %v480_v47 = vxor.u32 2147483648, %v479_v43  ;;  %v216_v1 = vshll.u32 %v612_v60, %v204_v11  ;;  %v220_v54 = vshrl.u32 %v614_v5, %v205_v8  ;;  %vm181_vm11 = vcmp.lt.s32.totalorder %v852_v28, 2 }
  0xd1   :  { %v533_v56 = vmin.u32 %v359_v53, %v859_v38  ;;  %v215_v2 = vor.u32 %v214_v41, %v213_v61  ;;  %v219_v13 = vshll.u32 %v613_v62, %v204_v11  ;;  %v878_v16 = vshll.u32 %v198_v40, 8 }
  0xd2   :  { %vm179_vm12 = vweird.f32 %v665_v18  ;;  %v481_v58 = vsel %vm398_vm3, %v480_v47, %v479_v43  ;;  %v349_v3 = vadd.s32 %v802_v39, %v808_v44  ;;  %v218_v60 = vor.u32 %v217_v63, %v216_v1 }
  0xd3   :  { %vm222_vm13 = vcmp.lt.s32.totalorder %v863_v55, 1  ;;  %v484_v5 = vsel %vm837_vm8, %v667_v19, %v481_v58  ;;  %v361_v4 = vclz %v533_v56  ;;  %v221_v6 = vor.u32 %v220_v54, %v219_v13 }
  0xd4   :  { %vm225_vm14 = vcmp.lt.s32.totalorder %v863_v55, 4  ;;  %572 = vcosq.f32 %v484_v5  ;;  %vm224_vm15 = vcmp.lt.s32.totalorder %v863_v55, 3  ;;  %v230_v62 = vsel %vm222_vm13, %v209_v59, %v212_v21 }
  0xd5   :  { %v231_v39 = vsel %vm225_vm14, %v218_v60, 920167782  ;;  %574 = vsinq.f32 %v484_v5  ;;  %v534_v42 = vadd.s32 4294967294, %v361_v4  ;;  %vm223_vm0 = vcmp.lt.s32.totalorder %v863_v55, 2 }
  0xd6   :  { %v569_v44 = vpop.eup %568  ;;  %v232_v7 = vsel %vm224_vm15, %v215_v2, %v231_v39  ;;  %v206_v36 = vshrl.u32 %v609_v52, %v205_v8  ;;  %v227_v10 = vsel %vm225_vm14, %v215_v2, 2102212464  ;;  %v234_v22 = vsel %vm222_vm13, %v212_v21, %v215_v2 }
  0xd7   :  { %v571_v9 = vpop.eup %570  ;;  %v186_v35 = vxor.u32 2147483648, %v569_v44  ;;  %v233_v11 = vsel %vm223_vm0, %v230_v62, %v232_v7  ;;  %vm535_vm1 = vcmp.lt.s32.totalorder %v534_v42, 0  ;;  %v235_v14 = vsel %vm225_vm14, %v221_v6, 1326507024 }
  0xd8   :  { %v183_v12 = vxor.u32 2147483648, %v571_v9  ;;  %v364_v17 = vsel %vm535_vm1, 0, %v534_v42  ;;  %v226_v52 = vsel %vm222_vm13, %v206_v36, %v209_v59  ;;  %v236_v57 = vsel %vm224_vm15, %v218_v60, %v235_v14 }
  0xd9   :  { %v187_v15 = vsel %vm185_vm9, %v186_v35, %v571_v9  ;;  %v365_v8 = vsub.s32 32, %v364_v17  ;;  %v369_v24 = vsub.s32 4294967266, %v364_v17  ;;  %v228_v26 = vsel %vm224_vm15, %v212_v21, %v227_v10 }
  0xda   :  { %v184_v20 = vsel %vm182_vm10, %v569_v44, %v183_v12  ;;  %v237_v29 = vsel %vm223_vm0, %v234_v22, %v236_v57  ;;  %v922_v30 = vmul.u32.u64.low %v878_v16, %v233_v11  ;;  %v923_v32 = vmul.u32.u64.high %v878_v16, %v233_v11, %v922_v30 }
  0xdb   :  { %v188_v23 = vsel %vm181_vm11, %v184_v20, %v187_v15  ;;  %v366_v34 = vshll.u32 %v859_v38, %v364_v17  ;;  %v367_v48 = vshrl.u32 %v349_v3, %v365_v8  ;;  %v370_v37 = vadd.s32 127, %v369_v24 }
  0xdc   :  { %v189_v33 = vsel %vm179_vm12, nan, %v188_v23  ;;  %v930_v40 = vmul.u32.u64.low %v878_v16, %v237_v29  ;;  %v931_v28 = vmul.u32.u64.high %v878_v16, %v237_v29, %v930_v40  ;;  %v229_v43 = vsel %vm223_vm0, %v226_v52, %v228_v26 }
  0xdd   :  { %503 = vst [vmem:[#allocation2] sm:$0xff] %v189_v33  ;;  %v368_v49 = vor.u32 %v367_v48, %v366_v34  ;;  %v371_v41 = vshll.u32 %v370_v37, 23  ;;  %v248_v53 = vadd.s32 1, %v923_v32  ;;  %v82_v18 = vadd.s32 24, %v866_v51 }
  0xde   :  { %v573_v45 = vpop.eup %572  ;;  %vm491_vm2 = vcmp.eq.s32.totalorder %v854_v31, 0  ;;  %v245_v63 = vmul.u32 %v878_v16, %v229_v43  ;;  %vm247_vm3 = vc.u32 %v931_v28, %v922_v30  ;;  %vm494_vm4 = vcmp.eq.s32.totalorder %v854_v31, 2 }
  0xdf   :  { %v575_v59 = vpop.eup %574  ;;  %v372_v61 = vor.u32 4788187, %v371_v41  ;;  %v495_v38 = vxor.u32 2147483648, %v573_v45  ;;  %v375_v21 = vcvt.s32.f32 %v368_v49  ;;  %v249_v1 = vsel %vm247_vm3, %v248_v53, %v923_v32 }
  0xe0   :  { %v492_v47 = vxor.u32 2147483648, %v575_v59  ;;  %v250_v56 = vadd.s32 %v249_v1, %v245_v63  ;;  %vm86_vm5 = vcmp.lt.s32.totalorder %v82_v18, 31  ;;  %vm490_vm6 = vcmp.lt.s32.totalorder %v854_v31, 2 }
  0xe1   :  { %v373_v55 = vand.u32 2147483647, %v372_v61  ;;  %v496_v54 = vsel %vm494_vm4, %v495_v38, %v575_v59  ;;  %vm488_vm7 = vweird.f32 %v667_v19  ;;  %vm295_vm8 = vcmp.lt.s32.totalorder %v673_v27, 0 }
  0xe2   :  { %v493_v51 = vsel %vm491_vm2, %v573_v45, %v492_v47  ;;  %v251_v16 = vadd.s32 536870912, %v250_v56  ;;  %vm294_vm9 = vcmp.le.f32.partialorder %v293_v50, 0.7853982  ;;  %v379_v31 = vsub.s32 4, %v845_v25 }
  0xe3   :  { %v376_v2 = vmul.f32 %v375_v21, %v373_v55  ;;  %v497_v13 = vsel %vm490_vm6, %v493_v51, %v496_v54  ;;  %v246_v15 = vadd.s32 %v922_v30, %v931_v28  ;;  %vm385_vm13 = vweird.f32 %v673_v27 }
  0xe4   :  { %v498_v58 = vsel %vm488_vm7, nan, %v497_v13  ;;  %v252_v5 = vshrl.u32 %v251_v16, 30  ;;  %v380_v44 = vsel %vm295_vm8, %v379_v31, %v845_v25  ;;  %vm192_vm15 = vcmp.lt.s32.totalorder %v680_v46, 0 }
  0xe5   :  { %v377_v3 = vxor.u32 2147483648, %v376_v2  ;;  %v502_v60 = vsel %vm86_vm5, %v498_v58, %v667_v19  ;;  %v382_v19 = vsel %vm294_vm9, 0, %v380_v44  ;;  %vm191_vm0 = vcmp.le.f32.partialorder %v190_v0, 0.7853982 }
  0xe6   :  { %506 = vst [vmem:[#allocation2 + $0x18] sm:$0xff] %v502_v60  ;;  %v253_v62 = vshll.u32 %v252_v5, 30  ;;  %v386_v35 = vand.u32 3, %v382_v19  ;;  %v276_v30 = vsub.s32 4, %v252_v5  ;;  %vm282_vm4 = vweird.f32 %v680_v46 }
  0xe7   :  { %v378_v4 = vsel %vm295_vm8, %v377_v3, %v376_v2 }
  0xe8   :  { %v381_v6 = vsel %vm294_vm9, %v673_v27, %v378_v4  ;;  %v254_v39 = vsub.s32 %v250_v56, %v253_v62  ;;  %vm388_vm11 = vcmp.eq.s32.totalorder %v386_v35, 0  ;;  %vm391_vm12 = vcmp.eq.s32.totalorder %v386_v35, 2 }
  0xe9   :  { %576 = vcosq.f32 %v381_v6  ;;  %vm387_vm14 = vcmp.lt.s32.totalorder %v386_v35, 2  ;;  %v277_v28 = vsel %vm192_vm15, %v276_v30, %v252_v5 }
  0xea   :  { %578 = vsinq.f32 %v381_v6  ;;  %v256_v42 = vsub.s32 0, %v254_v39  ;;  %v279_v49 = vsel %vm191_vm0, 0, %v277_v28 }
  0xeb   :  { %v283_v41 = vand.u32 3, %v279_v49 }
  0xec   :  { %v529_v7 = vmin.u32 %v256_v42, %v254_v39 }
  0xed   :  { %vm288_vm1 = vcmp.eq.s32.totalorder %v283_v41, 2  ;;  %vm285_vm2 = vcmp.eq.s32.totalorder %v283_v41, 0  ;;  %vm284_vm3 = vcmp.lt.s32.totalorder %v283_v41, 2 }
  0xee   :  { %v258_v9 = vclz %v529_v7 }
  0xf0   :  { %v530_v36 = vadd.s32 4294967294, %v258_v9 }
  0xf2   :  { %vm531_vm10 = vcmp.lt.s32.totalorder %v530_v36, 0 }
  0xf3   :  { %v577_v10 = vpop.eup %576  ;;  %v261_v22 = vsel %vm531_vm10, 0, %v530_v36 }
  0xf4   :  { %v579_v11 = vpop.eup %578  ;;  %v392_v50 = vxor.u32 2147483648, %v577_v10  ;;  %v262_v17 = vsub.s32 32, %v261_v22  ;;  %v266_v25 = vsub.s32 4294967266, %v261_v22  ;;  %v263_v20 = vshll.u32 %v254_v39, %v261_v22 }
  0xf5   :  { %v389_v12 = vxor.u32 2147483648, %v579_v11 }
  0xf6   :  { %v393_v14 = vsel %vm391_vm12, %v392_v50, %v579_v11  ;;  %v264_v8 = vshrl.u32 %v246_v15, %v262_v17  ;;  %v267_v24 = vadd.s32 127, %v266_v25 }
  0xf7   :  { %v390_v52 = vsel %vm388_vm11, %v577_v10, %v389_v12 }
  0xf8   :  { %v394_v57 = vsel %vm387_vm14, %v390_v52, %v393_v14  ;;  %v265_v23 = vor.u32 %v264_v8, %v263_v20  ;;  %v268_v29 = vshll.u32 %v267_v24, 23 }
  0xf9   :  { %v395_v26 = vsel %vm385_vm13, nan, %v394_v57 }
  0xfa   :  { %505 = vst [vmem:[#allocation2 + $0x10] sm:$0xff] %v395_v26  ;;  %v269_v32 = vor.u32 4788187, %v268_v29  ;;  %v272_v34 = vcvt.s32.f32 %v265_v23 }
  0xfc   :  { %v270_v33 = vand.u32 2147483647, %v269_v32 }
  0xfe   :  { %v273_v48 = vmul.f32 %v272_v34, %v270_v33 }
 0x100   :  { %v274_v37 = vxor.u32 2147483648, %v273_v48 }
 0x102   :  { %v275_v27 = vsel %vm192_vm15, %v274_v37, %v273_v48 }
 0x103   :  { %v278_v40 = vsel %vm191_vm0, %v680_v46, %v275_v27 }
 0x104   :  { %580 = vcosq.f32 %v278_v40 }
 0x105   :  { %582 = vsinq.f32 %v278_v40 }
 0x10e   :  { %v581_v43 = vpop.eup %580 }
 0x10f   :  { %v583_v45 = vpop.eup %582  ;;  %v289_v53 = vxor.u32 2147483648, %v581_v43 }
 0x110   :  { %v286_v18 = vxor.u32 2147483648, %v583_v45 }
 0x111   :  { %v290_v59 = vsel %vm288_vm1, %v289_v53, %v583_v45 }
 0x112   :  { %v287_v0 = vsel %vm285_vm2, %v581_v43, %v286_v18 }
 0x113   :  { %v291_v61 = vsel %vm284_vm3, %v287_v0, %v290_v59 }
 0x114   :  { %v292_v38 = vsel %vm282_vm4, nan, %v291_v61 }
 0x115   :  { %504 = vst [vmem:[#allocation2 + $0x8] sm:$0xff] %v292_v38 }
 0x116   :  { %595 = shalt.err (!%p592_p4)
}
 0x117   :  { %s596_s5 = scalar_lea.hbm %s975_s3, 512 }
 0x118   :  { %p597_p5 = scmp.ne.s32.totalorder %s975_s3, %s596_s5  ;;  %p600_p6 = scmp.lt.u32.totalorder %s596_s5, %s975_s3 }
 0x11a   :  { %p602_p7 = pnand %p600_p6, %p597_p5 }
 0x11c   :  { %605 = shalt.err (!%p602_p7)
}
 0x11d   :  { %s616_s10 = smov 128   ;;  %s617_s11 = smov 8  }
 0x11e   :  { %518 = dma.vmem_to_hbm [thread:$0]  %s513_s2, 512, %s975_s3, [#allocation3], %s616_s10, %s616_s10, %s617_s11  }
 0x11f   :  { %606 = dma.done.wait [#allocation3], 512  }
 0x120   :  { %607 = vsyncadd [#allocation3], 4294966784 }
 0x121   :  { %522 = vsyncpa [#allocation3], 1 }

</bundles_post_ra>
